<compile_context>
chip_gen: v6e
topology: v6e:2x2x1
jax: 0.10.0
libtpu: 0.0.40
codegen_flags: <defaults>
</compile_context>

<pallas_src>
import functools

import jax
import jax.numpy as jnp
from jax.experimental import pallas as pl
from jax.experimental.pallas import tpu as pltpu


def _residual_linear_kernel(x_ref, w_ref, b_ref, o_ref, *, matmul_dtype):
    """One (batch, time-tile, out-channel-tile) grid step.

    x_ref: (1, C, TT)   full input channels for this (b, t) tile
    w_ref: (CO, C)      output-channel slab of the weight
    b_ref: (CO, 1)      f32 bias slab
    o_ref: (1, CO, TT)  output slab
    """
    C = x_ref.shape[1]
    CO = o_ref.shape[1]

    x = x_ref[0]                                   # (C, TT)

    # MXU matmul: optionally bf16 inputs, always f32 accumulation.
    if matmul_dtype is not None:
        xm = x.astype(matmul_dtype)
        wm = w_ref[...].astype(matmul_dtype)       # already bf16 if pre-cast
    else:
        xm = x
        wm = w_ref[...]
    y = jnp.dot(wm, xm, preferred_element_type=jnp.float32)   # (CO, TT), f32

    # Epilogue in f32: bias + residual on the original (un-cast) x rows.
    y = y + b_ref[...]                             # bias broadcasts along T lanes
    if CO == C:
        x_res = x                                  # no O-tiling: full residual
    else:
        o_idx = pl.program_id(2)
        start = pl.multiple_of(o_idx * CO, CO)     # CO-aligned sublane offset
        x_res = x_ref[0, pl.ds(start, CO), :]      # (CO, TT)
    o_ref[0] = (y + x_res.astype(jnp.float32)).astype(o_ref.dtype)


def residual_linear(x_nct, weight, bias, *, t_tile=1024, co_tile=None,
                    use_bf16_matmul=None):
    """Residual(fn)(x) with fn = Linear over channels (Conv1d k=1), x in NCT."""
    B, C, T = x_nct.shape
    assert weight.shape == (C, C)
    assert bias.shape == (C,)

    # --- matmul input dtype -------------------------------------------------
    if use_bf16_matmul is None:
        use_bf16_matmul = C >= 256      # big enough that MXU rate matters
    matmul_dtype = jnp.bfloat16 if use_bf16_matmul else None
    # Pre-cast W in the wrapper (halves its DMA + VMEM residency); both matmul
    # operands are pinned to the same dtype in-kernel so nothing silently
    # promotes back to an f32 (multi-pass) MXU matmul.
    w_arg = weight.astype(jnp.bfloat16) if use_bf16_matmul else weight
    b_arg = bias.astype(jnp.float32).reshape(C, 1)   # f32 epilogue

    x_bytes = jnp.dtype(x_nct.dtype).itemsize
    w_bytes = jnp.dtype(w_arg.dtype).itemsize

    # --- output-channel tiling (keeps the resident W slab small for huge C) --
    if co_tile is None:
        co = C
        # Keep the double-buffered (co, C) weight slab under ~8 MiB.
        while (co > 256 and co % 2 == 0 and C % (co // 2) == 0
               and 2 * co * C * w_bytes > 8 * 1024 * 1024):
            co //= 2
    else:
        assert C % co_tile == 0 and (co_tile % 8 == 0 or co_tile == C)
        co = co_tile
    n_o = C // co

    # --- time tiling ----------------------------------------------------------
    if T <= t_tile:
        tt = T
        # v7x megacore: with B == 1, give the (parallel) time axis >= 2 tiles so
        # both TensorCores get work, when T splits cleanly into 128-multiples.
        if B == 1 and T >= 256 and T % 256 == 0:
            tt = T // 2
    else:
        assert t_tile % 128 == 0, "t_tile must be a multiple of 128 when T > t_tile"
        tt = t_tile

    # Shrink tt until the per-step double-buffered VMEM footprint fits the
    # budget (important on v7x: 64 MiB physical, 32 MiB default scoped).
    def _vmem_est(tt_):
        return (2 * C * tt_ * x_bytes       # x tile, double buffered
                + 2 * co * tt_ * x_bytes    # out tile, double buffered
                + 2 * co * C * w_bytes      # weight slab, double buffered
                + 2 * co * 4)               # bias
    vmem_budget = 24 * 1024 * 1024
    while tt >= 256 and tt % 256 == 0 and _vmem_est(tt) > vmem_budget:
        tt //= 2

    # Note: if T % tt != 0 the padded lanes of the last x block are
    # uninitialized VMEM; each output column depends only on its own input
    # column and padded output lanes are masked, so valid outputs are unaffected.
    grid = (B, pl.cdiv(T, tt), n_o)

    cost = pl.CostEstimate(
        flops=2 * B * T * C * C + 2 * B * T * C,
        transcendentals=0,
        bytes_accessed=2 * B * C * T * x_bytes + C * C * w_bytes + C * 4,
    )

    kernel = functools.partial(_residual_linear_kernel, matmul_dtype=matmul_dtype)

    out = pl.pallas_call(
        kernel,
        out_shape=jax.ShapeDtypeStruct((B, C, T), x_nct.dtype),
        grid_spec=pltpu.PrefetchScalarGridSpec(
            num_scalar_prefetch=0,
            grid=grid,
            in_specs=[
                # x tile: full channels, time-tiled; constant over the o axis
                # (o innermost), so it stays resident across output-channel slabs.
                pl.BlockSpec((1, C, tt), lambda b, t, o: (b, 0, t)),
                pl.BlockSpec((co, C), lambda b, t, o: (o, 0)),    # weight slab
                pl.BlockSpec((co, 1), lambda b, t, o: (o, 0)),    # bias slab
            ],
            out_specs=pl.BlockSpec((1, co, tt), lambda b, t, o: (b, o, t)),
        ),
        compiler_params=pltpu.CompilerParams(
            dimension_semantics=("parallel", "parallel", "parallel"),
            vmem_limit_bytes=64 * 1024 * 1024,
        ),
        cost_estimate=cost,
    )(x_nct, w_arg, b_arg)

    return out


def _reference(x_nct, weight, bias, matmul_dtype=None):
    # Pure-JAX reference: fn(x) + x with fn = Linear over channel axis (NCT).
    if matmul_dtype is not None:
        y = jnp.einsum("oc,bct->bot",
                       weight.astype(matmul_dtype), x_nct.astype(matmul_dtype),
                       preferred_element_type=jnp.float32)
    else:
        y = jnp.einsum("oc,bct->bot", weight, x_nct)
    y = y + bias[None, :, None].astype(jnp.float32)
    return (y + x_nct.astype(jnp.float32)).astype(x_nct.dtype)


if __name__ == "__main__":
    key = jax.random.PRNGKey(0)
    k_x, k_w, k_b, k_x2, k_w2, k_b2 = jax.random.split(key, 6)

    # 1) Tiny shape consistent with the module: f32 MXU path, tight tolerance.
    B, C, T = 2, 32, 8
    x = jax.random.normal(k_x, (B, C, T), dtype=jnp.float32)
    weight = jax.random.normal(k_w, (C, C), dtype=jnp.float32) * 0.1
    bias = jax.random.normal(k_b, (C,), dtype=jnp.float32) * 0.1

    out = jax.block_until_ready(residual_linear(x, weight, bias))
    ref = _reference(x, weight, bias)
    assert out.shape == x.shape
    assert jnp.allclose(out, ref, atol=1e-5, rtol=1e-5)

    # 2) Lane-dense shape exercising bf16 MXU inputs, output-channel tiling,
    #    and the B=1 megacore time split (grid = (1, 2, 2)).
    B2, C2, T2 = 1, 256, 512
    x2 = jax.random.normal(k_x2, (B2, C2, T2), dtype=jnp.float32)
    w2 = jax.random.normal(k_w2, (C2, C2), dtype=jnp.float32) * 0.05
    b2 = jax.random.normal(k_b2, (C2,), dtype=jnp.float32) * 0.05

    out2 = jax.block_until_ready(
        residual_linear(x2, w2, b2, co_tile=128, use_bf16_matmul=True))
    ref2 = _reference(x2, w2, b2, matmul_dtype=jnp.bfloat16)
    assert out2.shape == x2.shape
    assert jnp.allclose(out2, ref2, atol=2e-2, rtol=2e-2)

    print("KERNEL_OK")
</pallas_src>

<mosaic_0001>
module attributes {stable_mosaic.version = 11 : i64} {
  func.func @_residual_linear_kernel(%arg0: i32, %arg1: i32, %arg2: i32, %arg3: memref<1x32x8xf32, #tpu.memory_space<vmem>>, %arg4: memref<32x32xf32, #tpu.memory_space<vmem>>, %arg5: memref<32x1xf32, #tpu.memory_space<vmem>>, %arg6: memref<1x32x8xf32, #tpu.memory_space<vmem>>) attributes {dimension_semantics = [#tpu.dimension_semantics<parallel>, #tpu.dimension_semantics<parallel>, #tpu.dimension_semantics<parallel>], iteration_bounds = array<i64: 2, 1, 1>, scalar_prefetch = 0 : i64, scratch_operands = 0 : i64, tpu.core_type = #tpu.core_type<tc>, window_params = [{transform_indices = @transform_0, window_bounds = array<i64: 1, 32, 8>}, {transform_indices = @transform_1, window_bounds = array<i64: 32, 32>}, {transform_indices = @transform_2, window_bounds = array<i64: 32, 1>}, {transform_indices = @transform_3, window_bounds = array<i64: 1, 32, 8>}]} {
    %c0 = arith.constant 0 : index
    %c0_0 = arith.constant 0 : index
    %c0_1 = arith.constant 0 : index
    %0 = vector.load %arg3[%c0, %c0_0, %c0_1] : memref<1x32x8xf32, #tpu.memory_space<vmem>>, vector<1x32x8xf32>
    %1 = vector.shape_cast %0 : vector<1x32x8xf32> to vector<32x8xf32>
    %c0_2 = arith.constant 0 : index
    %c0_3 = arith.constant 0 : index
    %2 = vector.load %arg4[%c0_2, %c0_3] : memref<32x32xf32, #tpu.memory_space<vmem>>, vector<32x32xf32>
    %cst = arith.constant dense<0.000000e+00> : vector<32x8xf32>
    %3 = tpu.matmul %2, %1, %cst {dimension_numbers = #tpu.dot_dimension_numbers<[1], [0], [0], [1], [0, 0, 1, 1], [], []>} : vector<32x32xf32>, vector<32x8xf32>, vector<32x8xf32> -> vector<32x8xf32>
    %c0_4 = arith.constant 0 : index
    %c0_5 = arith.constant 0 : index
    %4 = vector.load %arg5[%c0_4, %c0_5] : memref<32x1xf32, #tpu.memory_space<vmem>>, vector<32x1xf32>
    %5 = vector.broadcast %4 : vector<32x1xf32> to vector<32x8xf32>
    %6 = arith.addf %3, %5 : vector<32x8xf32>
    %7 = arith.addf %6, %1 : vector<32x8xf32>
    %c0_6 = arith.constant 0 : index
    %c0_7 = arith.constant 0 : index
    %c0_8 = arith.constant 0 : index
    %8 = vector.load %arg6[%c0_6, %c0_7, %c0_8] : memref<1x32x8xf32, #tpu.memory_space<vmem>>, vector<1x32x8xf32>
    %9 = vector.shape_cast %8 : vector<1x32x8xf32> to vector<32x8xf32>
    %10 = vector.shape_cast %7 : vector<32x8xf32> to vector<1x32x8xf32>
    tpu.vector_store %arg6[%c0_6, %c0_7, %c0_8], %10 {strides = array<i32>} : memref<1x32x8xf32, #tpu.memory_space<vmem>>, vector<1x32x8xf32>,
    return
  }
  func.func @transform_0(%arg0: i32, %arg1: i32, %arg2: i32) -> (i32, i32, i32) {
    %c0_i32 = arith.constant 0 : i32
    %c0_i32_0 = arith.constant 0 : i32
    return %arg0, %c0_i32, %arg1 : i32, i32, i32
  }
  func.func @transform_1(%arg0: i32, %arg1: i32, %arg2: i32) -> (i32, i32) {
    %c0_i32 = arith.constant 0 : i32
    %c0_i32_0 = arith.constant 0 : i32
    return %arg2, %c0_i32 : i32, i32
  }
  func.func @transform_2(%arg0: i32, %arg1: i32, %arg2: i32) -> (i32, i32) {
    %c0_i32 = arith.constant 0 : i32
    %c0_i32_0 = arith.constant 0 : i32
    return %arg2, %c0_i32 : i32, i32
  }
  func.func @transform_3(%arg0: i32, %arg1: i32, %arg2: i32) -> (i32, i32, i32) {
    %c0_i32 = arith.constant 0 : i32
    return %arg0, %arg2, %arg1 : i32, i32, i32
  }
}

</mosaic_0001>

<bundles_post_ra>
// kernel: tpu_custom_call.1
= control target key start
LH: loop header
LB: loop body
LE: loop exit
PB: predicated region body
PF: predicated region fallthrough
CT: control target
= control target key end

     0   :  { %s654_s12 = smov 0   ;;  %s656_s13 = smov 0   ;;  %s722_s0 = inlined_call_operand.vmem [shape: f32[2,32,8], index: 0, kind: input, shape index: {}]   ;;  %s723_s1 = inlined_call_operand.vmem [shape: f32[32,32], index: 1, kind: input, shape index: {}]   ;;  %s724_s2 = inlined_call_operand.vmem [shape: f32[32,1], index: 2, kind: input, shape index: {}]   ;;  %s725_s3 = inlined_call_operand.vmem [shape: f32[2,32,8], index: 3, kind: output, shape index: {}]  }
   0x1   :  { %s658_s14 = smov 0  }
   0x2 LB: > { %s32_s15 = sadd.s32 1, %s627_s13  ;;  %p539_p0 = scmp.ge.s32.totalorder %s631_s14, 1  ;;  %s631_s14 = sphi %s658_s14, %s13_s14   ;;  %s627_s13 = sphi %s656_s13, %s727_s13   ;;  %s623_s12 = sphi %s654_s12, %s726_s12  }
   0x3   : > { %p34_p1 = scmp.ge.s32.totalorder %s32_s15, 2  ;;  %p187_p2 = scmp.lt.s32.totalorder %s631_s14, 3 }
   0x5   : > { %s729_s15 = smov (%p34_p1, %s32_s15), 0  ;;  %p188_p3 = pnand %p539_p0, %p187_p2 }
   0x6   : > { %p231_p4 = scmp.lt.s32.totalorder (!%p188_p3), %s623_s12, 1 }
   0x7   : > { %191 = sbr.rel (%p188_p3) target bundleno = 224 (0xe0), region = 32 }
   0xc   : > { %v268_v0 = vld [vmem:[%s723_s1] sm:$0xff]  ;;  %vm296_vm0 = vcmask 261120   ;;  %v270_v1 = vld [vmem:[%s723_s1 + $0x10] sm:$0xff]  ;;  %s731_s12 = smov (!%p231_p4, %s623_s12), 1  ;;  %v633_v4 = vmov 0   ;;  %v269_v9 = vld [vmem:[%s723_s1 + $0x8] sm:$0xff] }
   0xd   : > { %568 = vmatprep.mubr.msk.f32.mxu0 %vm296_vm0, %v268_v0  ;;  %571 = vmatprep.mubr.msk.f32.mxu1 %vm296_vm0, %v270_v1  ;;  %v274_v2 = vld [vmem:[%s724_s2 + $0x10] sm:$0xff]  ;;  %v272_v3 = vld [vmem:[%s724_s2] sm:$0xff]  ;;  %s550_s24 = sshll.u32 %s731_s12, 5  ;;  %v271_v10 = vld [vmem:[%s723_s1 + $0x18] sm:$0xff]  ;;  %vm398_vm1 = vcmask 64512  }
   0xe   : > { %608 = vset.pattern.permute.xlu1 %v633_v4  ;;  %607 = vset.pattern.permute.xlu0 %v633_v4  ;;  %s238_s27 = scalar_lea.vmem %s722_s0, %s550_s24  ;;  %v275_v11 = vld [vmem:[%s724_s2 + $0x18] sm:$0xff]  ;;  %v273_v12 = vld [vmem:[%s724_s2 + $0x8] sm:$0xff]  ;;  %s262_s11 = scalar_lea.vmem %s725_s3, %s550_s24 }
   0xf   : > { %288 = vperm.xlu1 %608, %v274_v2   ;;  %278 = vperm.xlu0 %607, %v272_v3   ;;  %v267_v5 = vld [vmem:[%s238_s27 + $0x18] sm:$0xff]  ;;  %v266_v6 = vld [vmem:[%s238_s27 + $0x10] sm:$0xff]  ;;  %v265_v7 = vld [vmem:[%s238_s27 + $0x8] sm:$0xff] }
  0x10   : > { %560 = vmatprep.subr.mxu0 %v267_v5  ;;  %574 = vmatprep.subr.mxu1 %v267_v5  ;;  %v264_v8 = vld [vmem:[%s238_s27] sm:$0xff] }
  0x11   : > { %561 = vmatpush3.msra.mxu0 %v267_v5  ;;  %578 = vmatpush3.msra.mxu1 %v267_v5 }
  0x12   : > { %562 = vmatprep.subr.mxu0 %v266_v6  ;;  %575 = vmatprep.subr.mxu1 %v266_v6 }
  0x13   : > { %563 = vmatpush3.msra.mxu0 %v266_v6  ;;  %579 = vmatpush3.msra.mxu1 %v266_v6 }
  0x14   : > { %564 = vmatprep.subr.mxu0 %v265_v7  ;;  %576 = vmatprep.subr.mxu1 %v265_v7 }
  0x15   : > { %565 = vmatpush3.msra.mxu0 %v265_v7  ;;  %580 = vmatpush3.msra.mxu1 %v265_v7 }
  0x16   : > { %566 = vmatprep.subr.mxu0 %v264_v8  ;;  %577 = vmatprep.subr.mxu1 %v264_v8 }
  0x17   : > { %567 = vmatpush3.msra.mxu0 %v264_v8  ;;  %581 = vmatpush3.msra.mxu1 %v264_v8 }
  0x18   : > { %569 = vmatmul.mubr.msk.f32.vlgmr.msra.gmra.mxu0 %vm296_vm0, %v269_v9  ;;  %572 = vmatmul.mubr.msk.f32.vlgmr.msra.gmra.mxu1 %vm296_vm0, %v271_v10 }
  0x19   : > { %293 = vperm.xlu1 %608, %v275_v11   ;;  %283 = vperm.xlu0 %607, %v273_v12  }
  0x8a   : > { %v289_v13 = vpop.permute.xlu1 %288  ;;  %v279_v14 = vpop.permute.xlu0 %278 }
  0x94   : > { %v294_v15 = vpop.permute.xlu1 %293  ;;  %v284_v16 = vpop.permute.xlu0 %283 }
  0xd8   : > { %v570_v17 = vpop.f32.mrf.mxu0  ;;  %v573_v18 = vpop.f32.mrf.mxu1 }
  0xd9   : > { %v381_v19 = vadd.f32 %v570_v17, %v284_v16  ;;  %v391_v20 = vadd.f32 %v573_v18, %v294_v15 }
  0xda   : > { %v375_v21 = vpop.f32.mrf.mxu0  ;;  %v385_v22 = vpop.f32.mrf.mxu1 }
  0xdb   : > { %v395_v23 = vadd.f32 %v381_v19, %v265_v7  ;;  %v397_v24 = vadd.f32 %v391_v20, %v267_v5  ;;  %v376_v25 = vadd.f32 %v375_v21, %v279_v14  ;;  %v386_v26 = vadd.f32 %v385_v22, %v289_v13 }
  0xdd   : > { %400 = vst.msk [vmem:[%s262_s11 + $0x8] sm:$0xff] %vm398_vm1, %v395_v23  ;;  %402 = vst.msk [vmem:[%s262_s11 + $0x18] sm:$0xff] %vm398_vm1, %v397_v24  ;;  %v394_v27 = vadd.f32 %v376_v25, %v264_v8  ;;  %v396_v28 = vadd.f32 %v386_v26, %v266_v6 }
  0xdf   : > { %399 = vst.msk [vmem:[%s262_s11] sm:$0xff] %vm398_vm1, %v394_v27  ;;  %401 = vst.msk [vmem:[%s262_s11 + $0x10] sm:$0xff] %vm398_vm1, %v396_v28 }
  0xe0 PF: > { %s13_s14 = sadd.s32 1, %s631_s14   ;;  %s726_s12 = smov %s627_s13 }
  0xe1   : > { %p10_p5 = scmp.ge.s32.totalorder %s13_s14, 4   ;;  %s727_s13 = smov %s729_s15 }
  0xe3   :  { %12 = sbr.rel (!%p10_p5) target bundleno = 2 (0x2), region = 68 }

</bundles_post_ra>
